<compile_context>
chip_gen: v7x
topology: tpu7x:2x2x1
jax: 0.10.0
libtpu: 0.0.40
codegen_flags: <defaults>
</compile_context>

<pallas_src>
import jax
import jax.numpy as jnp
from jax.experimental import pallas as pl
from jax.experimental.pallas import tpu as pltpu


def _affine_kernel(ac_ref, x_ref, o_ref):
    # ac_ref: (2,) f32 in SMEM holding [a, c].  x_ref/o_ref: same-shaped VMEM.
    o_ref[...] = x_ref[...] * ac_ref[0] + ac_ref[1]


def collapse_params(w1, b1, w2, b2):
    """Collapse Linear(1,10) -> Linear(10,1) into packed [a, c] of shape (2,).

    Weights use the (in, out) convention; if loading a real PyTorch
    state_dict (stored as (out, in)), transpose the weights first.
    Call this ONCE at init — params are static across forward calls.
    """
    a = (w1 @ w2).reshape(())           # scalar
    c = (b1 @ w2 + b2).reshape(())      # scalar
    return jnp.stack([a, c]).astype(jnp.float32)


_LANE = 128
_BLOCK_ROWS = 2048                      # (2048, 128) f32 = 1 MiB per buffer
_LANE_DENSE_THRESHOLD = 64 * 1024       # below this, dispatch overhead dominates


def _forward_small(ac, x):
    # Natural (N, 1) full-array block; x aliased onto the output buffer.
    return pl.pallas_call(
        _affine_kernel,
        out_shape=jax.ShapeDtypeStruct(x.shape, x.dtype),
        in_specs=[
            pl.BlockSpec(memory_space=pltpu.MemorySpace.SMEM),  # [a, c]
            pl.BlockSpec(memory_space=pltpu.MemorySpace.VMEM),  # x
        ],
        out_specs=pl.BlockSpec(memory_space=pltpu.MemorySpace.VMEM),
        input_output_aliases={1: 0},
    )(ac, x)


def _forward_large(ac, x):
    # Lane-dense, tiled, megacore-parallel path for big batches.
    n = x.shape[0]
    block_elems = _BLOCK_ROWS * _LANE
    n_pad = pl.cdiv(n, block_elems) * block_elems
    x_flat = x.reshape(n)
    if n_pad != n:
        x_flat = jnp.pad(x_flat, (0, n_pad - n))
    rows = n_pad // _LANE
    x_dense = x_flat.reshape(rows, _LANE)

    out_dense = pl.pallas_call(
        _affine_kernel,
        out_shape=jax.ShapeDtypeStruct((rows, _LANE), x.dtype),
        grid=(rows // _BLOCK_ROWS,),
        in_specs=[
            pl.BlockSpec(memory_space=pltpu.MemorySpace.SMEM),   # [a, c]
            pl.BlockSpec((_BLOCK_ROWS, _LANE), lambda i: (i, 0)),
        ],
        out_specs=pl.BlockSpec((_BLOCK_ROWS, _LANE), lambda i: (i, 0)),
        input_output_aliases={1: 0},
        compiler_params=pltpu.CompilerParams(
            dimension_semantics=("parallel",)),
    )(ac, x_dense)
    return out_dense.reshape(n_pad, 1)[:n]


def mlp_forward(ac, x):
    """out = (x @ w1 + b1) @ w2 + b2, with params pre-collapsed into `ac`."""
    if x.shape[0] >= _LANE_DENSE_THRESHOLD:
        return _forward_large(ac, x)
    return _forward_small(ac, x)


def init_params(key):
    # Deterministic init mimicking PyTorch's default Linear init:
    # U(-1/sqrt(fan_in), 1/sqrt(fan_in)).  Weights stored as (in, out).
    k1, k2, k3, k4 = jax.random.split(key, 4)
    bound1 = 1.0 / jnp.sqrt(1.0)    # fan_in = 1
    bound2 = 1.0 / jnp.sqrt(10.0)   # fan_in = 10
    w1 = jax.random.uniform(k1, (1, 10), jnp.float32, -bound1, bound1)
    b1 = jax.random.uniform(k2, (1, 10), jnp.float32, -bound1, bound1)
    w2 = jax.random.uniform(k3, (10, 1), jnp.float32, -bound2, bound2)
    b2 = jax.random.uniform(k4, (1, 1), jnp.float32, -bound2, bound2)
    return w1, b1, w2, b2


if __name__ == "__main__":
    key = jax.random.PRNGKey(0)
    k_x, k_p = jax.random.split(key)

    # Matches `x = torch.rand([500, 1])` from the reference script.
    x = jax.random.uniform(k_x, (500, 1), jnp.float32)
    w1, b1, w2, b2 = init_params(k_p)

    # Plain-JAX two-layer reference (computed first, before any aliasing).
    ref = (x @ w1 + b1) @ w2 + b2

    # One-time parameter collapse; per-call path is a single Pallas dispatch.
    ac = collapse_params(w1, b1, w2, b2)
    forward = jax.jit(mlp_forward)

    out = forward(ac, x)
    out = jax.block_until_ready(out)

    assert out.shape == (500, 1), out.shape
    assert jnp.allclose(out, ref, atol=1e-5, rtol=1e-5), "mismatch vs reference"

    print("KERNEL_OK")
</pallas_src>

<mosaic_0001>
module attributes {stable_mosaic.version = 11 : i64} {
  func.func @_affine_kernel(%arg0: memref<2xf32, #tpu.memory_space<smem>>, %arg1: memref<500x1xf32, #tpu.memory_space<vmem>>, %arg2: memref<500x1xf32, #tpu.memory_space<vmem>>) attributes {dimension_semantics = [], scalar_prefetch = 0 : i64, scratch_operands = 0 : i64, tpu.core_type = #tpu.core_type<tc>} {
    %c0 = arith.constant 0 : index
    %c0_0 = arith.constant 0 : index
    %0 = vector.load %arg1[%c0, %c0_0] : memref<500x1xf32, #tpu.memory_space<vmem>>, vector<500x1xf32>
    %c0_1 = arith.constant 0 : index
    %1 = memref.load %arg0[%c0_1] : memref<2xf32, #tpu.memory_space<smem>>
    %2 = vector.broadcast %1 : f32 to vector<500x1xf32>
    %3 = arith.mulf %0, %2 : vector<500x1xf32>
    %c1 = arith.constant 1 : index
    %4 = memref.load %arg0[%c1] : memref<2xf32, #tpu.memory_space<smem>>
    %5 = vector.broadcast %4 : f32 to vector<500x1xf32>
    %6 = arith.addf %3, %5 : vector<500x1xf32>
    %c0_2 = arith.constant 0 : index
    %c0_3 = arith.constant 0 : index
    %7 = vector.load %arg2[%c0_2, %c0_3] : memref<500x1xf32, #tpu.memory_space<vmem>>, vector<500x1xf32>
    tpu.vector_store %arg2[%c0_2, %c0_3], %6 {strides = array<i32>} : memref<500x1xf32, #tpu.memory_space<vmem>>, vector<500x1xf32>,
    return
  }
}

</mosaic_0001>

<bundles_post_ra>
// kernel: mlp_forward.1
= control target key start
LH: loop header
LB: loop body
LE: loop exit
PB: predicated region body
PF: predicated region fallthrough
CT: control target
= control target key end

     0   :  { %7 = vsyncpa [#allocation3], 0  ;;  %s892_s0 = inlined_call_operand.vmem [shape: f32[2], index: 0, kind: input, shape index: {}]   ;;  %s893_s1 = inlined_call_operand.vmem [shape: f32[500,1], index: 1, kind: input, shape index: {}, may-alias: {1,2}]   ;;  %s894_s2 = inlined_call_operand.vmem [shape: f32[500,1], index: 2, kind: output, shape index: {}, may-alias: {1,2}]  }
   0x1   :  { %s14_s11 = sshll.u32 %s892_s0, 4  ;;  %s15_s11 = int_to_ptr.vmem [resolvable:$true] %s14_s11 }
   0x2   :  { %s289_s12 = scalar_lea.vmem %s15_s11, 16  ;;  %p294_p1 = scmp.lt.s32.totalorder %s15_s11, %s15_s11 }
   0x3   :  { %p290_p0 = scmp.ne.s32.totalorder %s15_s11, %s289_s12  ;;  %p295_p2 = scmp.lt.s32.totalorder %s289_s12, %s289_s12 }
   0x5   :  { %p296_p3 = por %p295_p2, %p294_p1 }
   0x7   :  { %p297_p4 = pnand %p296_p3, %p290_p0 }
   0x9   :  { %300 = shalt.err (!%p297_p4)
}
   0xa   :  { %s303_s13 = smov [#allocation2]  }
   0xb   :  { %17 = dma.vmem_to_smem %s15_s11, 16, %s303_s13, [#allocation3]  }
   0xc   :  { %301 = dma.done.wait [#allocation3], 16  }
   0xd   :  { %302 = vsyncadd [#allocation3], 4294967280 }
   0xe   :  { %23 = sfence }
   0xf   :  { %s87_s14 = sld [smem:[#allocation2]]  ;;  %s287_s15 = sld [smem:[#allocation2 + $0x1]]  ;;  %v24_v0 = vld [vmem:[%s893_s1] sm:$0xff]  ;;  %v25_v1 = vld [vmem:[%s893_s1 + $0x8] sm:$0xff]  ;;  %v26_v2 = vld [vmem:[%s893_s1 + $0x10] sm:$0xff]  ;;  %vm217_vm0 = vcmask 7168  }
  0x10   :  { %v27_v3 = vld [vmem:[%s893_s1 + $0x18] sm:$0xff]  ;;  %v28_v4 = vld [vmem:[%s893_s1 + $0x20] sm:$0xff]  ;;  %v29_v5 = vld [vmem:[%s893_s1 + $0x28] sm:$0xff]  ;;  %vm280_vm1 = vcmask 3072  }
  0x11   :  { %v30_v6 = vld [vmem:[%s893_s1 + $0x30] sm:$0xff]  ;;  %v31_v7 = vld [vmem:[%s893_s1 + $0x38] sm:$0xff]  ;;  %v32_v14 = vld [vmem:[%s893_s1 + $0x40] sm:$0xff] }
  0x12   :  { %v33_v15 = vld [vmem:[%s893_s1 + $0x48] sm:$0xff]  ;;  %v34_v20 = vld [vmem:[%s893_s1 + $0x50] sm:$0xff]  ;;  %v35_v21 = vld [vmem:[%s893_s1 + $0x58] sm:$0xff] }
  0x13   :  { %v36_v22 = vld [vmem:[%s893_s1 + $0x60] sm:$0xff]  ;;  %v37_v27 = vld [vmem:[%s893_s1 + $0x68] sm:$0xff]  ;;  %v38_v28 = vld [vmem:[%s893_s1 + $0x70] sm:$0xff] }
  0x14   :  { %v39_v29 = vld [vmem:[%s893_s1 + $0x78] sm:$0xff] }
  0x15   :  { %v346_v8 = vstv %s87_s14  ;;  %v348_v9 = vstv %s287_s15 }
  0x16   :  { %v89_v10 = vmul.f32 %v346_v8, %v24_v0  ;;  %v90_v11 = vmul.f32 %v346_v8, %v25_v1  ;;  %v91_v12 = vmul.f32 %v346_v8, %v26_v2  ;;  %v92_v13 = vmul.f32 %v346_v8, %v27_v3 }
  0x17   :  { %v93_v16 = vmul.f32 %v346_v8, %v28_v4  ;;  %v94_v17 = vmul.f32 %v346_v8, %v29_v5  ;;  %v95_v18 = vmul.f32 %v346_v8, %v30_v6  ;;  %v96_v19 = vmul.f32 %v346_v8, %v31_v7 }
  0x18   :  { %v154_v23 = vadd.f32 %v348_v9, %v89_v10  ;;  %v155_v24 = vadd.f32 %v348_v9, %v90_v11  ;;  %v156_v25 = vadd.f32 %v348_v9, %v91_v12  ;;  %v157_v26 = vadd.f32 %v348_v9, %v92_v13 }
  0x19   :  { %v158_v30 = vadd.f32 %v348_v9, %v93_v16  ;;  %v159_v31 = vadd.f32 %v348_v9, %v94_v17  ;;  %v160_v32 = vadd.f32 %v348_v9, %v95_v18  ;;  %v161_v33 = vadd.f32 %v348_v9, %v96_v19 }
  0x1a   :  { %218 = vst.msk [vmem:[%s894_s2] sm:$0xff] %vm217_vm0, %v154_v23  ;;  %219 = vst.msk [vmem:[%s894_s2 + $0x8] sm:$0xff] %vm217_vm0, %v155_v24  ;;  %v97_v34 = vmul.f32 %v346_v8, %v32_v14  ;;  %v98_v35 = vmul.f32 %v346_v8, %v33_v15  ;;  %v99_v36 = vmul.f32 %v346_v8, %v34_v20 }
  0x1b   :  { %220 = vst.msk [vmem:[%s894_s2 + $0x10] sm:$0xff] %vm217_vm0, %v156_v25  ;;  %221 = vst.msk [vmem:[%s894_s2 + $0x18] sm:$0xff] %vm217_vm0, %v157_v26  ;;  %v100_v37 = vmul.f32 %v346_v8, %v35_v21  ;;  %v101_v40 = vmul.f32 %v346_v8, %v36_v22  ;;  %v102_v41 = vmul.f32 %v346_v8, %v37_v27 }
  0x1c   :  { %v103_v42 = vmul.f32 %v346_v8, %v38_v28  ;;  %v104_v43 = vmul.f32 %v346_v8, %v39_v29  ;;  %v162_v47 = vadd.f32 %v348_v9, %v97_v34  ;;  %v163_v48 = vadd.f32 %v348_v9, %v98_v35 }
  0x1d   :  { %v164_v49 = vadd.f32 %v348_v9, %v99_v36  ;;  %v165_v50 = vadd.f32 %v348_v9, %v100_v37  ;;  %v166_v54 = vadd.f32 %v348_v9, %v101_v40  ;;  %v167_v55 = vadd.f32 %v348_v9, %v102_v41 }
  0x1e   :  { %v168_v56 = vadd.f32 %v348_v9, %v103_v42  ;;  %v169_v57 = vadd.f32 %v348_v9, %v104_v43 }
  0x22   :  { %v40_v38 = vld [vmem:[%s893_s1 + $0x80] sm:$0xff]  ;;  %v41_v39 = vld [vmem:[%s893_s1 + $0x88] sm:$0xff] }
  0x23   :  { %222 = vst.msk [vmem:[%s894_s2 + $0x20] sm:$0xff] %vm217_vm0, %v158_v30  ;;  %223 = vst.msk [vmem:[%s894_s2 + $0x28] sm:$0xff] %vm217_vm0, %v159_v31  ;;  %v105_v58 = vmul.f32 %v346_v8, %v40_v38  ;;  %v106_v59 = vmul.f32 %v346_v8, %v41_v39 }
  0x24   :  { %224 = vst.msk [vmem:[%s894_s2 + $0x30] sm:$0xff] %vm217_vm0, %v160_v32  ;;  %225 = vst.msk [vmem:[%s894_s2 + $0x38] sm:$0xff] %vm217_vm0, %v161_v33 }
  0x25   :  { %v170_v7 = vadd.f32 %v348_v9, %v105_v58  ;;  %v171_v10 = vadd.f32 %v348_v9, %v106_v59 }
  0x2b   :  { %v42_v44 = vld [vmem:[%s893_s1 + $0x90] sm:$0xff]  ;;  %v43_v45 = vld [vmem:[%s893_s1 + $0x98] sm:$0xff]  ;;  %v44_v46 = vld [vmem:[%s893_s1 + $0xa0] sm:$0xff] }
  0x2c   :  { %v45_v51 = vld [vmem:[%s893_s1 + $0xa8] sm:$0xff]  ;;  %v46_v52 = vld [vmem:[%s893_s1 + $0xb0] sm:$0xff]  ;;  %v47_v53 = vld [vmem:[%s893_s1 + $0xb8] sm:$0xff]  ;;  %v107_v60 = vmul.f32 %v346_v8, %v42_v44  ;;  %v108_v61 = vmul.f32 %v346_v8, %v43_v45  ;;  %v109_v0 = vmul.f32 %v346_v8, %v44_v46 }
  0x2d   :  { %226 = vst.msk [vmem:[%s894_s2 + $0x40] sm:$0xff] %vm217_vm0, %v162_v47  ;;  %227 = vst.msk [vmem:[%s894_s2 + $0x48] sm:$0xff] %vm217_vm0, %v163_v48  ;;  %v110_v1 = vmul.f32 %v346_v8, %v45_v51  ;;  %v111_v2 = vmul.f32 %v346_v8, %v46_v52  ;;  %v112_v3 = vmul.f32 %v346_v8, %v47_v53 }
  0x2e   :  { %228 = vst.msk [vmem:[%s894_s2 + $0x50] sm:$0xff] %vm217_vm0, %v164_v49  ;;  %229 = vst.msk [vmem:[%s894_s2 + $0x58] sm:$0xff] %vm217_vm0, %v165_v50  ;;  %v172_v11 = vadd.f32 %v348_v9, %v107_v60  ;;  %v173_v12 = vadd.f32 %v348_v9, %v108_v61  ;;  %v174_v16 = vadd.f32 %v348_v9, %v109_v0 }
  0x2f   :  { %v175_v17 = vadd.f32 %v348_v9, %v110_v1  ;;  %v176_v18 = vadd.f32 %v348_v9, %v111_v2  ;;  %v177_v19 = vadd.f32 %v348_v9, %v112_v3 }
  0x35   :  { %v48_v62 = vld [vmem:[%s893_s1 + $0xc0] sm:$0xff]  ;;  %v49_v63 = vld [vmem:[%s893_s1 + $0xc8] sm:$0xff] }
  0x36   :  { %230 = vst.msk [vmem:[%s894_s2 + $0x60] sm:$0xff] %vm217_vm0, %v166_v54  ;;  %231 = vst.msk [vmem:[%s894_s2 + $0x68] sm:$0xff] %vm217_vm0, %v167_v55  ;;  %v113_v20 = vmul.f32 %v346_v8, %v48_v62  ;;  %v114_v21 = vmul.f32 %v346_v8, %v49_v63 }
  0x37   :  { %232 = vst.msk [vmem:[%s894_s2 + $0x70] sm:$0xff] %vm217_vm0, %v168_v56  ;;  %233 = vst.msk [vmem:[%s894_s2 + $0x78] sm:$0xff] %vm217_vm0, %v169_v57 }
  0x38   :  { %v178_v33 = vadd.f32 %v348_v9, %v113_v20  ;;  %v179_v34 = vadd.f32 %v348_v9, %v114_v21 }
  0x3e   :  { %v50_v4 = vld [vmem:[%s893_s1 + $0xd0] sm:$0xff]  ;;  %v51_v5 = vld [vmem:[%s893_s1 + $0xd8] sm:$0xff]  ;;  %v52_v6 = vld [vmem:[%s893_s1 + $0xe0] sm:$0xff] }
  0x3f   :  { %v53_v13 = vld [vmem:[%s893_s1 + $0xe8] sm:$0xff]  ;;  %v54_v14 = vld [vmem:[%s893_s1 + $0xf0] sm:$0xff]  ;;  %v55_v15 = vld [vmem:[%s893_s1 + $0xf8] sm:$0xff]  ;;  %v115_v22 = vmul.f32 %v346_v8, %v50_v4  ;;  %v116_v23 = vmul.f32 %v346_v8, %v51_v5  ;;  %v117_v26 = vmul.f32 %v346_v8, %v52_v6 }
  0x40   :  { %234 = vst.msk [vmem:[%s894_s2 + $0x80] sm:$0xff] %vm217_vm0, %v170_v7  ;;  %235 = vst.msk [vmem:[%s894_s2 + $0x88] sm:$0xff] %vm217_vm0, %v171_v10  ;;  %v118_v27 = vmul.f32 %v346_v8, %v53_v13  ;;  %v119_v28 = vmul.f32 %v346_v8, %v54_v14  ;;  %v120_v29 = vmul.f32 %v346_v8, %v55_v15 }
  0x41   :  { %236 = vst.msk [vmem:[%s894_s2 + $0x90] sm:$0xff] %vm217_vm0, %v172_v11  ;;  %237 = vst.msk [vmem:[%s894_s2 + $0x98] sm:$0xff] %vm217_vm0, %v173_v12  ;;  %v180_v35 = vadd.f32 %v348_v9, %v115_v22  ;;  %v181_v36 = vadd.f32 %v348_v9, %v116_v23  ;;  %v182_v40 = vadd.f32 %v348_v9, %v117_v26 }
  0x42   :  { %v183_v41 = vadd.f32 %v348_v9, %v118_v27  ;;  %v184_v42 = vadd.f32 %v348_v9, %v119_v28  ;;  %v185_v43 = vadd.f32 %v348_v9, %v120_v29 }
  0x48   :  { %v56_v24 = vld [vmem:[%s893_s1 + $0x100] sm:$0xff]  ;;  %v57_v25 = vld [vmem:[%s893_s1 + $0x108] sm:$0xff] }
  0x49   :  { %238 = vst.msk [vmem:[%s894_s2 + $0xa0] sm:$0xff] %vm217_vm0, %v174_v16  ;;  %239 = vst.msk [vmem:[%s894_s2 + $0xa8] sm:$0xff] %vm217_vm0, %v175_v17  ;;  %v121_v44 = vmul.f32 %v346_v8, %v56_v24  ;;  %v122_v45 = vmul.f32 %v346_v8, %v57_v25 }
  0x4a   :  { %240 = vst.msk [vmem:[%s894_s2 + $0xb0] sm:$0xff] %vm217_vm0, %v176_v18  ;;  %241 = vst.msk [vmem:[%s894_s2 + $0xb8] sm:$0xff] %vm217_vm0, %v177_v19 }
  0x4b   :  { %v186_v57 = vadd.f32 %v348_v9, %v121_v44  ;;  %v187_v58 = vadd.f32 %v348_v9, %v122_v45 }
  0x51   :  { %v58_v30 = vld [vmem:[%s893_s1 + $0x110] sm:$0xff]  ;;  %v59_v31 = vld [vmem:[%s893_s1 + $0x118] sm:$0xff]  ;;  %v60_v32 = vld [vmem:[%s893_s1 + $0x120] sm:$0xff] }
  0x52   :  { %v61_v37 = vld [vmem:[%s893_s1 + $0x128] sm:$0xff]  ;;  %v62_v38 = vld [vmem:[%s893_s1 + $0x130] sm:$0xff]  ;;  %v63_v39 = vld [vmem:[%s893_s1 + $0x138] sm:$0xff]  ;;  %v123_v46 = vmul.f32 %v346_v8, %v58_v30  ;;  %v124_v47 = vmul.f32 %v346_v8, %v59_v31  ;;  %v125_v50 = vmul.f32 %v346_v8, %v60_v32 }
  0x53   :  { %242 = vst.msk [vmem:[%s894_s2 + $0xc0] sm:$0xff] %vm217_vm0, %v178_v33  ;;  %243 = vst.msk [vmem:[%s894_s2 + $0xc8] sm:$0xff] %vm217_vm0, %v179_v34  ;;  %v126_v51 = vmul.f32 %v346_v8, %v61_v37  ;;  %v127_v52 = vmul.f32 %v346_v8, %v62_v38  ;;  %v128_v53 = vmul.f32 %v346_v8, %v63_v39 }
  0x54   :  { %244 = vst.msk [vmem:[%s894_s2 + $0xd0] sm:$0xff] %vm217_vm0, %v180_v35  ;;  %245 = vst.msk [vmem:[%s894_s2 + $0xd8] sm:$0xff] %vm217_vm0, %v181_v36  ;;  %v188_v59 = vadd.f32 %v348_v9, %v123_v46  ;;  %v189_v60 = vadd.f32 %v348_v9, %v124_v47  ;;  %v190_v0 = vadd.f32 %v348_v9, %v125_v50 }
  0x55   :  { %v191_v1 = vadd.f32 %v348_v9, %v126_v51  ;;  %v192_v2 = vadd.f32 %v348_v9, %v127_v52  ;;  %v193_v3 = vadd.f32 %v348_v9, %v128_v53 }
  0x5b   :  { %v64_v48 = vld [vmem:[%s893_s1 + $0x140] sm:$0xff]  ;;  %v65_v49 = vld [vmem:[%s893_s1 + $0x148] sm:$0xff] }
  0x5c   :  { %246 = vst.msk [vmem:[%s894_s2 + $0xe0] sm:$0xff] %vm217_vm0, %v182_v40  ;;  %247 = vst.msk [vmem:[%s894_s2 + $0xe8] sm:$0xff] %vm217_vm0, %v183_v41  ;;  %v129_v4 = vmul.f32 %v346_v8, %v64_v48  ;;  %v130_v5 = vmul.f32 %v346_v8, %v65_v49 }
  0x5d   :  { %248 = vst.msk [vmem:[%s894_s2 + $0xf0] sm:$0xff] %vm217_vm0, %v184_v42  ;;  %249 = vst.msk [vmem:[%s894_s2 + $0xf8] sm:$0xff] %vm217_vm0, %v185_v43 }
  0x5e   :  { %v194_v19 = vadd.f32 %v348_v9, %v129_v4  ;;  %v195_v20 = vadd.f32 %v348_v9, %v130_v5 }
  0x64   :  { %v66_v54 = vld [vmem:[%s893_s1 + $0x150] sm:$0xff]  ;;  %v67_v55 = vld [vmem:[%s893_s1 + $0x158] sm:$0xff]  ;;  %v68_v56 = vld [vmem:[%s893_s1 + $0x160] sm:$0xff] }
  0x65   :  { %v69_v61 = vld [vmem:[%s893_s1 + $0x168] sm:$0xff]  ;;  %v70_v62 = vld [vmem:[%s893_s1 + $0x170] sm:$0xff]  ;;  %v71_v63 = vld [vmem:[%s893_s1 + $0x178] sm:$0xff]  ;;  %v131_v6 = vmul.f32 %v346_v8, %v66_v54  ;;  %v132_v7 = vmul.f32 %v346_v8, %v67_v55  ;;  %v133_v12 = vmul.f32 %v346_v8, %v68_v56 }
  0x66   :  { %250 = vst.msk [vmem:[%s894_s2 + $0x100] sm:$0xff] %vm217_vm0, %v186_v57  ;;  %251 = vst.msk [vmem:[%s894_s2 + $0x108] sm:$0xff] %vm217_vm0, %v187_v58  ;;  %v134_v13 = vmul.f32 %v346_v8, %v69_v61  ;;  %v135_v14 = vmul.f32 %v346_v8, %v70_v62  ;;  %v136_v15 = vmul.f32 %v346_v8, %v71_v63 }
  0x67   :  { %252 = vst.msk [vmem:[%s894_s2 + $0x110] sm:$0xff] %vm217_vm0, %v188_v59  ;;  %253 = vst.msk [vmem:[%s894_s2 + $0x118] sm:$0xff] %vm217_vm0, %v189_v60  ;;  %v196_v21 = vadd.f32 %v348_v9, %v131_v6  ;;  %v197_v22 = vadd.f32 %v348_v9, %v132_v7  ;;  %v198_v26 = vadd.f32 %v348_v9, %v133_v12 }
  0x68   :  { %v199_v27 = vadd.f32 %v348_v9, %v134_v13  ;;  %v200_v28 = vadd.f32 %v348_v9, %v135_v14  ;;  %v201_v29 = vadd.f32 %v348_v9, %v136_v15 }
  0x6e   :  { %v72_v10 = vld [vmem:[%s893_s1 + $0x180] sm:$0xff]  ;;  %v73_v11 = vld [vmem:[%s893_s1 + $0x188] sm:$0xff] }
  0x6f   :  { %254 = vst.msk [vmem:[%s894_s2 + $0x120] sm:$0xff] %vm217_vm0, %v190_v0  ;;  %255 = vst.msk [vmem:[%s894_s2 + $0x128] sm:$0xff] %vm217_vm0, %v191_v1  ;;  %v137_v30 = vmul.f32 %v346_v8, %v72_v10  ;;  %v138_v31 = vmul.f32 %v346_v8, %v73_v11 }
  0x70   :  { %256 = vst.msk [vmem:[%s894_s2 + $0x130] sm:$0xff] %vm217_vm0, %v192_v2  ;;  %257 = vst.msk [vmem:[%s894_s2 + $0x138] sm:$0xff] %vm217_vm0, %v193_v3 }
  0x71   :  { %v202_v42 = vadd.f32 %v348_v9, %v137_v30  ;;  %v203_v43 = vadd.f32 %v348_v9, %v138_v31 }
  0x77   :  { %v74_v16 = vld [vmem:[%s893_s1 + $0x190] sm:$0xff]  ;;  %v75_v17 = vld [vmem:[%s893_s1 + $0x198] sm:$0xff]  ;;  %v76_v18 = vld [vmem:[%s893_s1 + $0x1a0] sm:$0xff] }
  0x78   :  { %v77_v23 = vld [vmem:[%s893_s1 + $0x1a8] sm:$0xff]  ;;  %v78_v24 = vld [vmem:[%s893_s1 + $0x1b0] sm:$0xff]  ;;  %v79_v25 = vld [vmem:[%s893_s1 + $0x1b8] sm:$0xff]  ;;  %v139_v32 = vmul.f32 %v346_v8, %v74_v16  ;;  %v140_v33 = vmul.f32 %v346_v8, %v75_v17  ;;  %v141_v35 = vmul.f32 %v346_v8, %v76_v18 }
  0x79   :  { %258 = vst.msk [vmem:[%s894_s2 + $0x140] sm:$0xff] %vm217_vm0, %v194_v19  ;;  %259 = vst.msk [vmem:[%s894_s2 + $0x148] sm:$0xff] %vm217_vm0, %v195_v20  ;;  %v142_v36 = vmul.f32 %v346_v8, %v77_v23  ;;  %v143_v37 = vmul.f32 %v346_v8, %v78_v24  ;;  %v144_v38 = vmul.f32 %v346_v8, %v79_v25 }
  0x7a   :  { %260 = vst.msk [vmem:[%s894_s2 + $0x150] sm:$0xff] %vm217_vm0, %v196_v21  ;;  %261 = vst.msk [vmem:[%s894_s2 + $0x158] sm:$0xff] %vm217_vm0, %v197_v22  ;;  %v204_v44 = vadd.f32 %v348_v9, %v139_v32  ;;  %v205_v45 = vadd.f32 %v348_v9, %v140_v33  ;;  %v206_v49 = vadd.f32 %v348_v9, %v141_v35 }
  0x7b   :  { %v207_v50 = vadd.f32 %v348_v9, %v142_v36  ;;  %v208_v51 = vadd.f32 %v348_v9, %v143_v37  ;;  %v209_v52 = vadd.f32 %v348_v9, %v144_v38 }
  0x81   :  { %v80_v34 = vld [vmem:[%s893_s1 + $0x1c0] sm:$0xff] }
  0x82   :  { %262 = vst.msk [vmem:[%s894_s2 + $0x160] sm:$0xff] %vm217_vm0, %v198_v26  ;;  %263 = vst.msk [vmem:[%s894_s2 + $0x168] sm:$0xff] %vm217_vm0, %v199_v27  ;;  %v145_v53 = vmul.f32 %v346_v8, %v80_v34 }
  0x83   :  { %264 = vst.msk [vmem:[%s894_s2 + $0x170] sm:$0xff] %vm217_vm0, %v200_v28  ;;  %265 = vst.msk [vmem:[%s894_s2 + $0x178] sm:$0xff] %vm217_vm0, %v201_v29 }
  0x84   :  { %v210_v60 = vadd.f32 %v348_v9, %v145_v53 }
  0x8a   :  { %v81_v39 = vld [vmem:[%s893_s1 + $0x1c8] sm:$0xff]  ;;  %v82_v40 = vld [vmem:[%s893_s1 + $0x1d0] sm:$0xff]  ;;  %v83_v41 = vld [vmem:[%s893_s1 + $0x1d8] sm:$0xff] }
  0x8b   :  { %v84_v46 = vld [vmem:[%s893_s1 + $0x1e0] sm:$0xff]  ;;  %v85_v47 = vld [vmem:[%s893_s1 + $0x1e8] sm:$0xff]  ;;  %v86_v48 = vld [vmem:[%s893_s1 + $0x1f0] sm:$0xf]  ;;  %v146_v54 = vmul.f32 %v346_v8, %v81_v39  ;;  %v147_v55 = vmul.f32 %v346_v8, %v82_v40  ;;  %v148_v56 = vmul.f32 %v346_v8, %v83_v41 }
  0x8c   :  { %266 = vst.msk [vmem:[%s894_s2 + $0x180] sm:$0xff] %vm217_vm0, %v202_v42  ;;  %267 = vst.msk [vmem:[%s894_s2 + $0x188] sm:$0xff] %vm217_vm0, %v203_v43  ;;  %v149_v57 = vmul.f32 %v346_v8, %v84_v46  ;;  %v150_v58 = vmul.f32 %v346_v8, %v85_v47  ;;  %v151_v59 = vmul.f32 %v346_v8, %v86_v48 }
  0x8d   :  { %268 = vst.msk [vmem:[%s894_s2 + $0x190] sm:$0xff] %vm217_vm0, %v204_v44  ;;  %269 = vst.msk [vmem:[%s894_s2 + $0x198] sm:$0xff] %vm217_vm0, %v205_v45  ;;  %v211_v61 = vadd.f32 %v348_v9, %v146_v54  ;;  %v212_v62 = vadd.f32 %v348_v9, %v147_v55  ;;  %v213_v63 = vadd.f32 %v348_v9, %v148_v56 }
  0x8e   :  { %270 = vst.msk [vmem:[%s894_s2 + $0x1a0] sm:$0xff] %vm217_vm0, %v206_v49  ;;  %271 = vst.msk [vmem:[%s894_s2 + $0x1a8] sm:$0xff] %vm217_vm0, %v207_v50  ;;  %v214_v0 = vadd.f32 %v348_v9, %v149_v57  ;;  %v215_v1 = vadd.f32 %v348_v9, %v150_v58  ;;  %v216_v2 = vadd.f32 %v348_v9, %v151_v59 }
  0x8f   :  { %272 = vst.msk [vmem:[%s894_s2 + $0x1b0] sm:$0xff] %vm217_vm0, %v208_v51  ;;  %273 = vst.msk [vmem:[%s894_s2 + $0x1b8] sm:$0xff] %vm217_vm0, %v209_v52 }
  0x90   :  { %274 = vst.msk [vmem:[%s894_s2 + $0x1c0] sm:$0xff] %vm217_vm0, %v210_v60  ;;  %275 = vst.msk [vmem:[%s894_s2 + $0x1c8] sm:$0xff] %vm217_vm0, %v211_v61 }
  0x91   :  { %276 = vst.msk [vmem:[%s894_s2 + $0x1d0] sm:$0xff] %vm217_vm0, %v212_v62  ;;  %277 = vst.msk [vmem:[%s894_s2 + $0x1d8] sm:$0xff] %vm217_vm0, %v213_v63 }
  0x92   :  { %278 = vst.msk [vmem:[%s894_s2 + $0x1e0] sm:$0xff] %vm217_vm0, %v214_v0  ;;  %279 = vst.msk [vmem:[%s894_s2 + $0x1e8] sm:$0xff] %vm217_vm0, %v215_v1 }
  0x93   :  { %281 = vst.msk [vmem:[%s894_s2 + $0x1f0] sm:$0xf] %vm280_vm1, %v216_v2 }
  0x94   :  { %286 = vsyncpa [#allocation3], 1 }

</bundles_post_ra>
